<compile_context>
chip_gen: v5e
topology: v5e:2x2
jax: 0.10.0
libtpu: 0.0.40
codegen_flags: <defaults>
</compile_context>

<pallas_src>
import functools
import math

import jax
import jax.numpy as jnp
from jax import lax
from jax.experimental import pallas as pl
from jax.experimental.pallas import tpu as pltpu


# --------------------------------------------------------------------------- #
# Positional-encoding table (matches the PyTorch buffer).                      #
# --------------------------------------------------------------------------- #
def _build_pe(d_model: int, max_len: int) -> jnp.ndarray:
    """Deterministic sinusoidal positional-encoding table, shape (max_len, 1, d_model)."""
    position = jnp.arange(0, max_len, dtype=jnp.float32)[:, None]            # (max_len, 1)
    div_term = jnp.exp(
        jnp.arange(0, d_model, 2, dtype=jnp.float32) * (-math.log(10000.0) / d_model)
    )                                                                         # (ceil(d/2),)
    angles = position * div_term                                              # (max_len, ceil(d/2))
    pe = jnp.zeros((max_len, d_model), dtype=jnp.float32)
    pe = pe.at[:, 0::2].set(jnp.sin(angles))
    pe = pe.at[:, 1::2].set(jnp.cos(angles)[:, : d_model // 2])               # odd d_model safe
    return pe[:, None, :]                                                     # (max_len, 1, d_model)


# --------------------------------------------------------------------------- #
# Tile planning (VMEM-footprint aware, conservative across TPU generations).   #
# --------------------------------------------------------------------------- #
_SUBLANE_FOR_ITEMSIZE = {4: 8, 2: 16, 1: 32}
_LANE = 128


def _round_up(n: int, m: int) -> int:
    return ((n + m - 1) // m) * m


def _padded_face_bytes(rows: int, cols: int, itemsize: int) -> int:
    """Bytes of a 2-D (rows, cols) face once padded to VMEM (sublane, 128) tiling."""
    sub = _SUBLANE_FOR_ITEMSIZE.get(itemsize, 8)
    return _round_up(max(rows, 1), sub) * _round_up(max(cols, 1), _LANE) * itemsize


def _plan_3d(S: int, B: int, D: int, itemsize: int, target: int):
    """Pick (tS, tB) for (tS, tB, D) blocks, ~`target` bytes of padded x per tile."""
    sub = _SUBLANE_FOR_ITEMSIZE.get(itemsize, 8)
    face = _padded_face_bytes(B, D, itemsize)
    if face <= target:
        tB = B
        tS = min(S, max(1, target // face))
        if tS < S and tS % 8 != 0:
            # pe block is (tS, D): tS must be a multiple of 8 unless it spans all of S.
            tS = max(8, (tS // 8) * 8)
    else:
        # The (B, D) face alone exceeds the budget: tile the batch axis too.
        tS = min(S, 8)
        row = tS * _round_up(D, _LANE) * itemsize
        tB = min(B, max(sub, ((target // row) // sub) * sub))
    # Megacore (v7x has 2 TensorCores): ensure >= 2 grid tiles when the shape allows.
    if pl.cdiv(S, tS) * pl.cdiv(B, tB) == 1 and S >= 16:
        tS = min(S, _round_up((S + 1) // 2, 8))
    return tS, tB


def _plan_2d(S: int, C: int, itemsize: int, target: int):
    """Pick (tR, tC) for (tR, tC) blocks of the flattened (S, B*D) slab."""
    row = _round_up(C, _LANE) * itemsize
    if row <= target:
        tC = C
        tR = min(S, max(1, target // row))
        if tR < S and tR % 8 != 0:
            tR = max(8, (tR // 8) * 8)
    else:
        tR = min(S, 8)
        tC = min(C, max(_LANE, ((target // (tR * itemsize)) // _LANE) * _LANE))
    if pl.cdiv(S, tR) * pl.cdiv(C, tC) == 1 and S >= 16:
        tR = min(S, _round_up((S + 1) // 2, 8))
    return tR, tC


# --------------------------------------------------------------------------- #
# Portable counter-based PRNG for the dropout mask (plain uint32 VPU ops).     #
# --------------------------------------------------------------------------- #
def _mix32(x):
    """murmur3-style 32-bit finalizer (wrapping uint32 arithmetic)."""
    x = x ^ (x >> 16)
    x = x * jnp.uint32(0x7FEB352D)
    x = x ^ (x >> 15)
    x = x * jnp.uint32(0x846CA68B)
    x = x ^ (x >> 16)
    return x


def _keep_mask(elem_id_u32, seed_u32, threshold: int):
    """P(keep) = 1 - p  where  threshold = round(p * 2^32)."""
    mixed_seed = _mix32(seed_u32 * jnp.uint32(2654435761) ^ jnp.uint32(0x9E3779B9))
    bits = _mix32(elem_id_u32 ^ mixed_seed)
    return bits >= jnp.uint32(threshold)


# --------------------------------------------------------------------------- #
# Kernel bodies.                                                               #
# --------------------------------------------------------------------------- #
def _pe_add_kernel_3d(x_ref, pe_ref, o_ref):
    # x_ref: (tS, tB, D); pe_ref: (tS, D) broadcast over the batch axis in-kernel.
    o_ref[...] = (x_ref[...] + pe_ref[...][:, None, :]).astype(o_ref.dtype)


def _pe_add_dropout_kernel_3d(seed_ref, x_ref, pe_ref, o_ref, *,
                              threshold, scale, tS, tB, B, D):
    y = x_ref[...] + pe_ref[...][:, None, :]
    shape = y.shape
    s_idx = pl.program_id(0) * tS + lax.broadcasted_iota(jnp.int32, shape, 0)
    b_idx = pl.program_id(1) * tB + lax.broadcasted_iota(jnp.int32, shape, 1)
    d_idx = lax.broadcasted_iota(jnp.int32, shape, 2)
    elem = ((s_idx * B + b_idx) * D + d_idx).astype(jnp.uint32)
    keep = _keep_mask(elem, seed_ref[0].astype(jnp.uint32), threshold)
    o_ref[...] = jnp.where(keep, y * scale, jnp.zeros_like(y)).astype(o_ref.dtype)


def _pe_add_kernel_2d(x_ref, pe_ref, o_ref):
    o_ref[...] = (x_ref[...] + pe_ref[...]).astype(o_ref.dtype)


def _pe_add_dropout_kernel_2d(seed_ref, x_ref, pe_ref, o_ref, *,
                              threshold, scale, tR, tC, C):
    y = x_ref[...] + pe_ref[...]
    shape = y.shape
    r_idx = pl.program_id(0) * tR + lax.broadcasted_iota(jnp.int32, shape, 0)
    c_idx = pl.program_id(1) * tC + lax.broadcasted_iota(jnp.int32, shape, 1)
    elem = (r_idx * C + c_idx).astype(jnp.uint32)
    keep = _keep_mask(elem, seed_ref[0].astype(jnp.uint32), threshold)
    o_ref[...] = jnp.where(keep, y * scale, jnp.zeros_like(y)).astype(o_ref.dtype)


# --------------------------------------------------------------------------- #
# Host-side wrapper.                                                           #
# --------------------------------------------------------------------------- #
def positional_encoding_forward(
    x: jnp.ndarray,
    pe: jnp.ndarray,
    *,
    dropout_p: float = 0.1,
    training: bool = False,
    seed: int = 0,
    donate_x: bool = False,
    target_tile_bytes: int = 4 << 20,
) -> jnp.ndarray:
    """x: (S, B, D); pe: (max_len, 1, D). Returns dropout(x + pe[:S]).

    donate_x: only set True when the caller actually donates x's buffer (jit
    donate_argnums); otherwise aliasing would force a defensive HBM copy.
    """
    S, B, D = x.shape
    if S > pe.shape[0]:
        raise ValueError(f"seq_len {S} exceeds positional-encoding max_len {pe.shape[0]}")
    apply_dropout = training and dropout_p > 0.0
    if apply_dropout and dropout_p >= 1.0:
        raise ValueError("dropout_p must be < 1.0 in training mode")

    pe_sd = pe.reshape(pe.shape[0], pe.shape[-1])[:S].astype(x.dtype)     # (S, D), squeezed
    itemsize = jnp.dtype(x.dtype).itemsize

    lane_dense_3d = D >= _LANE      # D already fills lanes -> keep (tS, tB, D) blocks

    if lane_dense_3d:
        tS, tB = _plan_3d(S, B, D, itemsize, target_tile_bytes)
        grid = (pl.cdiv(S, tS), pl.cdiv(B, tB))
        x_spec = pl.BlockSpec((tS, tB, D), lambda i, j, *_: (i, j, 0))
        pe_spec = pl.BlockSpec((tS, D), lambda i, j, *_: (i, 0))
        out_spec = pl.BlockSpec((tS, tB, D), lambda i, j, *_: (i, j, 0))
        out_shape = jax.ShapeDtypeStruct((S, B, D), x.dtype)
        x_in, pe_in = x, pe_sd
        x_tile_bytes = tS * _padded_face_bytes(tB, D, itemsize)
        pe_tile_bytes = _padded_face_bytes(tS, D, itemsize)
        eval_kernel = _pe_add_kernel_3d
        def make_dropout_kernel(threshold, scale):
            return functools.partial(_pe_add_dropout_kernel_3d, threshold=threshold,
                                     scale=scale, tS=tS, tB=tB, B=B, D=D)
        needs_reshape_back = False
    else:
        # Narrow last dim: flatten to a lane-dense (S, B*D) slab. pe is pre-broadcast
        # per row in the wrapper (only B*pe extra traffic, acceptable for small faces).
        C = B * D
        tR, tC = _plan_2d(S, C, itemsize, target_tile_bytes)
        grid = (pl.cdiv(S, tR), pl.cdiv(C, tC))
        x_spec = pl.BlockSpec((tR, tC), lambda i, j, *_: (i, j))
        pe_spec = pl.BlockSpec((tR, tC), lambda i, j, *_: (i, j))
        out_spec = pl.BlockSpec((tR, tC), lambda i, j, *_: (i, j))
        out_shape = jax.ShapeDtypeStruct((S, C), x.dtype)
        x_in = x.reshape(S, C)
        pe_in = jnp.broadcast_to(pe_sd[:, None, :], (S, B, D)).reshape(S, C)
        x_tile_bytes = _padded_face_bytes(tR, tC, itemsize)
        pe_tile_bytes = x_tile_bytes
        eval_kernel = _pe_add_kernel_2d
        def make_dropout_kernel(threshold, scale):
            return functools.partial(_pe_add_dropout_kernel_2d, threshold=threshold,
                                     scale=scale, tR=tR, tC=tC, C=C)
        needs_reshape_back = True

    # Scoped-VMEM budget: double-buffered x + out + pe tiles plus headroom, clamped so
    # it stays inside v7x's 64 MiB/TC while exceeding v5e's 16 MiB scoped default.
    vmem_limit = 2 * (2 * x_tile_bytes + pe_tile_bytes) + (4 << 20)
    vmem_limit = int(min(max(vmem_limit, 16 << 20), 64 << 20))
    compiler_params = pltpu.CompilerParams(
        dimension_semantics=("parallel", "parallel"),
        vmem_limit_bytes=vmem_limit,
    )

    if not apply_dropout:
        call_kwargs = dict(
            out_shape=out_shape,
            grid_spec=pltpu.PrefetchScalarGridSpec(
                num_scalar_prefetch=0, grid=grid,
                in_specs=[x_spec, pe_spec], out_specs=out_spec),
            compiler_params=compiler_params,
        )
        if donate_x:
            call_kwargs["input_output_aliases"] = {0: 0}
        out = pl.pallas_call(eval_kernel, **call_kwargs)(x_in, pe_in)
    else:
        threshold = min(int(round(dropout_p * (2 ** 32))), 2 ** 32 - 1)
        scale = 1.0 / (1.0 - dropout_p)
        kernel = make_dropout_kernel(threshold, scale)
        seed_arr = jnp.asarray([seed], dtype=jnp.int32)
        call_kwargs = dict(
            out_shape=out_shape,
            grid_spec=pltpu.PrefetchScalarGridSpec(
                num_scalar_prefetch=1, grid=grid,          # seed lands in SMEM
                in_specs=[x_spec, pe_spec], out_specs=out_spec),
            compiler_params=compiler_params,
        )
        if donate_x:
            call_kwargs["input_output_aliases"] = {1: 0}    # x is arg index 1 (after seed)
        out = pl.pallas_call(kernel, **call_kwargs)(seed_arr, x_in, pe_in)

    if needs_reshape_back:
        out = out.reshape(S, B, D)
    return out


if __name__ == "__main__":
    d_model = 32
    max_len = 1000
    seq = 8
    batch = 2
    p = 0.1

    pe = _build_pe(d_model, max_len)
    key = jax.random.PRNGKey(0)
    x = jax.random.normal(key, (seq, batch, d_model), dtype=jnp.float32)

    # Plain-JAX reference.
    ref = x + pe[:seq]
    jax.block_until_ready(ref)

    # --- Eval mode: dropout == identity, exact check. ---
    out_eval = positional_encoding_forward(x, pe, dropout_p=p, training=False)
    jax.block_until_ready(out_eval)
    assert out_eval.shape == (seq, batch, d_model)
    assert jnp.allclose(out_eval, ref, atol=1e-6), "eval-mode mismatch vs reference"

    # --- Training mode: fused inverted dropout. Each element must be 0 or ref/(1-p). ---
    out_train = positional_encoding_forward(x, pe, dropout_p=p, training=True, seed=0)
    jax.block_until_ready(out_train)
    assert out_train.shape == (seq, batch, d_model)
    scaled = ref / (1.0 - p)
    ok = jnp.isclose(out_train, 0.0, atol=1e-6) | jnp.isclose(
        out_train, scaled, rtol=1e-5, atol=1e-5
    )
    assert bool(jnp.all(ok)), "training-mode output is not a zeroed/scaled version of reference"

    print("KERNEL_OK")
</pallas_src>

<mosaic_0001>
module attributes {stable_mosaic.version = 11 : i64} {
  func.func @_pe_add_kernel_2d(%arg0: i32, %arg1: i32, %arg2: memref<8x64xf32, #tpu.memory_space<vmem>>, %arg3: memref<8x64xf32, #tpu.memory_space<vmem>>, %arg4: memref<8x64xf32, #tpu.memory_space<vmem>>) attributes {dimension_semantics = [#tpu.dimension_semantics<parallel>, #tpu.dimension_semantics<parallel>], iteration_bounds = array<i64: 1, 1>, scalar_prefetch = 0 : i64, scratch_operands = 0 : i64, tpu.core_type = #tpu.core_type<tc>, window_params = [{transform_indices = @transform_0, window_bounds = array<i64: 8, 64>}, {transform_indices = @transform_1, window_bounds = array<i64: 8, 64>}, {transform_indices = @transform_2, window_bounds = array<i64: 8, 64>}]} {
    %c0 = arith.constant 0 : index
    %c0_0 = arith.constant 0 : index
    %0 = vector.load %arg2[%c0, %c0_0] : memref<8x64xf32, #tpu.memory_space<vmem>>, vector<8x64xf32>
    %c0_1 = arith.constant 0 : index
    %c0_2 = arith.constant 0 : index
    %1 = vector.load %arg3[%c0_1, %c0_2] : memref<8x64xf32, #tpu.memory_space<vmem>>, vector<8x64xf32>
    %2 = arith.addf %0, %1 : vector<8x64xf32>
    %c0_3 = arith.constant 0 : index
    %c0_4 = arith.constant 0 : index
    %3 = vector.load %arg4[%c0_3, %c0_4] : memref<8x64xf32, #tpu.memory_space<vmem>>, vector<8x64xf32>
    tpu.vector_store %arg4[%c0_3, %c0_4], %2 {strides = array<i32>} : memref<8x64xf32, #tpu.memory_space<vmem>>, vector<8x64xf32>,
    return
  }
  func.func @transform_0(%arg0: i32, %arg1: i32) -> (i32, i32) {
    %c0_i32 = arith.constant 0 : i32
    return %arg0, %arg1 : i32, i32
  }
  func.func @transform_1(%arg0: i32, %arg1: i32) -> (i32, i32) {
    %c0_i32 = arith.constant 0 : i32
    return %arg0, %arg1 : i32, i32
  }
  func.func @transform_2(%arg0: i32, %arg1: i32) -> (i32, i32) {
    %c0_i32 = arith.constant 0 : i32
    return %arg0, %arg1 : i32, i32
  }
}

</mosaic_0001>

<bundles_post_ra>
// kernel: tpu_custom_call.1
= control target key start
LH: loop header
LB: loop body
LE: loop exit
PB: predicated region body
PF: predicated region fallthrough
CT: control target
= control target key end

     0   :  { %7 = vsyncpa [#allocation3], 0  ;;  %s171_s0 = inlined_call_operand.hbm [shape: f32[8,64], index: 0, kind: input, shape index: {}]   ;;  %s172_s1 = inlined_call_operand.hbm [shape: f32[8,64], index: 1, kind: input, shape index: {}]   ;;  %s173_s2 = inlined_call_operand.hbm [shape: f32[8,64], index: 2, kind: output, shape index: {}]  }
   0x1   :  { %8 = vsyncpa [#allocation6], 0 }
   0x2   :  { %9 = vsyncpa [#allocation4], 0  ;;  %s15_s11 = sshll.u32 %s171_s0, 4  ;;  %s144_s12 = smov [#allocation2]   ;;  %s16_s11 = int_to_ptr.hbm [resolvable:$true] %s15_s11 }
   0x3   :  { %s17_s13 = sshll.u32 %s144_s12, 4  ;;  %s26_s16 = sshll.u32 %s172_s1, 4  ;;  %s18_s13 = int_to_ptr.vmem [resolvable:$true] %s17_s13  ;;  %s27_s16 = int_to_ptr.hbm [resolvable:$true] %s26_s16 }
   0x4   :  { %20 = dma.hbm_to_vmem [thread:$0]  %s16_s11, 128, %s18_s13, [#allocation3]  }
   0x5   :  { %s145_s17 = smov [#allocation5]  }
   0x6   :  { %s28_s18 = sshll.u32 %s145_s17, 4  ;;  %s29_s18 = int_to_ptr.vmem [resolvable:$true] %s28_s18 }
   0x7   :  { %31 = dma.hbm_to_vmem [thread:$0]  %s27_s16, 128, %s29_s18, [#allocation6]  }
   0x8   :  { %138 = dma.done.wait [#allocation3], 128  }
   0x9   :  { %139 = vsyncadd [#allocation3], 4294967168 }
   0xa   :  { %140 = dma.done.wait [#allocation6], 128  }
   0xb   :  { %141 = vsyncadd [#allocation6], 4294967168  ;;  %s146_s19 = smov [#allocation7]   ;;  %s52_s22 = sshll.u32 %s173_s2, 4  ;;  %v40_v0 = vld [vmem:[#allocation2] sm:$0xff]  ;;  %v41_v1 = vld [vmem:[#allocation5] sm:$0xff]  ;;  %s53_s22 = int_to_ptr.hbm [resolvable:$true] %s52_s22 }
   0xc   :  { %s50_s0 = sshll.u32 %s146_s19, 4  ;;  %vm43_vm0 = vcmask 523264   ;;  %v42_v2 = vadd.f32 %v41_v1, %v40_v0  ;;  %s51_s0 = int_to_ptr.vmem [resolvable:$true] %s50_s0 }
   0xe   :  { %44 = vst.msk [vmem:[#allocation7] sm:$0xff] %vm43_vm0, %v42_v2 }
   0xf   :  { %55 = dma.vmem_to_hbm [thread:$0]  %s51_s0, 128, %s53_s22, [#allocation4]  }
  0x10   :  { %142 = dma.done.wait [#allocation4], 128  }
  0x11   :  { %143 = vsyncadd [#allocation4], 4294967168 }
  0x12   :  { %60 = vsyncpa [#allocation3], 1 }
  0x13   :  { %61 = vsyncpa [#allocation6], 1 }
  0x14   :  { %62 = vsyncpa [#allocation4], 1 }

</bundles_post_ra>
